<compile_context>
chip_gen: v7x
topology: tpu7x:2x2x1
jax: 0.10.0
libtpu: 0.0.40
codegen_flags: <defaults>
</compile_context>

<pallas_src>
import jax
import jax.numpy as jnp
from jax.experimental import pallas as pl
from jax.experimental.pallas import tpu as pltpu


def _attention_gate_kernel(g_ref, x_ref, wg_ref, wx_ref, b_ref,
                           wpsi_ref, bpsi_ref, out_ref):
    # g_ref: (F_g, tm), x_ref: (F_l, tm)  -- channels on sublanes, spatial on lanes
    g = g_ref[...].astype(jnp.float32)
    x = x_ref[...].astype(jnp.float32)

    # Fused gating/feature 1x1 convs (+ folded BN): one ReLU input, one bias add.
    a = (jnp.dot(wg_ref[...], g, preferred_element_type=jnp.float32)
         + jnp.dot(wx_ref[...], x, preferred_element_type=jnp.float32)
         + b_ref[...])                                  # (F_int, tm)
    a = jnp.maximum(a, 0.0)

    # psi projection F_int -> 1 as VPU multiply + sublane (XLU) reduction:
    # avoids a row-sparse single-output MXU push.
    psi_lin = jnp.sum(a * wpsi_ref[...], axis=0, keepdims=True) + bpsi_ref[...]
    psi = jax.nn.sigmoid(psi_lin)                       # (1, tm)

    # Gate the features; psi broadcasts over the channel (sublane) axis.
    out_ref[...] = (x * psi).astype(out_ref.dtype)


def _pick_row_tile(M, target):
    """Lane-axis tile: full extent if small, else a multiple of 128 <= target."""
    if M <= target:
        return M
    return max((target // 128) * 128, 128)


def attention_gate_flat(g3, x3, wg, wx, b_sum, wpsi_col, bpsi, *, tm_target=1024):
    """g3: (N, F_g, M), x3: (N, F_l, M). Returns (N, F_l, M)."""
    N, F_g, M = g3.shape
    _, F_l, _ = x3.shape
    F_int = wg.shape[0]

    tm = _pick_row_tile(M, tm_target)
    grid = (N, pl.cdiv(M, tm))                 # partial tail blocks are masked on store

    full2d = lambda shape: pl.BlockSpec(shape, lambda n, i: (0, 0))

    return pl.pallas_call(
        _attention_gate_kernel,
        out_shape=jax.ShapeDtypeStruct((N, F_l, M), x3.dtype),
        grid_spec=pltpu.PrefetchScalarGridSpec(
            num_scalar_prefetch=0,
            grid=grid,
            in_specs=[
                pl.BlockSpec((None, F_g, tm), lambda n, i: (n, 0, i)),  # g rows
                pl.BlockSpec((None, F_l, tm), lambda n, i: (n, 0, i)),  # x rows
                full2d((F_int, F_g)),                                   # W_g (folded)
                full2d((F_int, F_l)),                                   # W_x (folded)
                full2d((F_int, 1)),                                     # b_g + b_x (folded)
                full2d((F_int, 1)),                                     # W_psi (folded, column)
                full2d((1, 1)),                                         # b_psi (folded)
            ],
            out_specs=pl.BlockSpec((None, F_l, tm), lambda n, i: (n, 0, i)),
        ),
        compiler_params=pltpu.CompilerParams(
            dimension_semantics=("parallel", "parallel"),
            vmem_limit_bytes=64 * 1024 * 1024),
    )(g3, x3, wg, wx, b_sum, wpsi_col, bpsi)


def _fold_bn(w, b, gamma, beta, mean, var, eps=1e-5):
    """Fold eval-mode BatchNorm into a 1x1 conv stored as (Cout, Cin)."""
    scale = gamma / jnp.sqrt(var + eps)        # (Cout,)
    w_f = w * scale[:, None]                   # (Cout, Cin)
    b_f = (b - mean) * scale + beta            # (Cout,)
    return w_f, b_f


def attention_gate(g_nchw, x_nchw, params, *, tm_target=1024):
    """NCHW in / NCHW out, matching the PyTorch module interface (eval mode)."""
    N, F_g, H, W = g_nchw.shape
    _, F_l, _, _ = x_nchw.shape
    F_int = params["wg"].shape[0]
    M = H * W

    wg, bg = _fold_bn(params["wg"], params["bg"], params["gn_g_gamma"],
                      params["gn_g_beta"], params["gn_g_mean"], params["gn_g_var"])
    wx, bx = _fold_bn(params["wx"], params["bx"], params["gn_x_gamma"],
                      params["gn_x_beta"], params["gn_x_mean"], params["gn_x_var"])
    wpsi, bpsi = _fold_bn(params["wpsi"], params["bpsi"], params["gn_p_gamma"],
                          params["gn_p_beta"], params["gn_p_mean"], params["gn_p_var"])

    b_sum = (bg + bx).reshape(F_int, 1)        # fused branch bias, broadcast over lanes
    wpsi_col = wpsi.reshape(F_int, 1)          # (1, F_int) -> (F_int, 1) column
    bpsi = bpsi.reshape(1, 1)

    # NCHW -> (N, C, H*W): pure reshape, no transpose / extra HBM pass.
    g3 = g_nchw.reshape(N, F_g, M)
    x3 = x_nchw.reshape(N, F_l, M)

    out = attention_gate_flat(g3, x3, wg, wx, b_sum, wpsi_col, bpsi,
                              tm_target=tm_target)
    return out.reshape(N, F_l, H, W)


def make_params(key, F_g, F_l, F_int):
    ks = jax.random.split(key, 6)
    p = {
        # 1x1 conv weights stored as (Cout, Cin) (PyTorch Conv2d layout, squeezed)
        "wg": jax.random.normal(ks[0], (F_int, F_g), jnp.float32) * 0.1,
        "bg": jax.random.normal(ks[1], (F_int,), jnp.float32) * 0.1,
        "wx": jax.random.normal(ks[2], (F_int, F_l), jnp.float32) * 0.1,
        "bx": jax.random.normal(ks[3], (F_int,), jnp.float32) * 0.1,
        "wpsi": jax.random.normal(ks[4], (1, F_int), jnp.float32) * 0.1,
        "bpsi": jax.random.normal(ks[5], (1,), jnp.float32) * 0.1,
        # BatchNorm params (fresh-init PyTorch values), eval mode.
        "gn_g_gamma": jnp.ones((F_int,)), "gn_g_beta": jnp.zeros((F_int,)),
        "gn_g_mean": jnp.zeros((F_int,)), "gn_g_var": jnp.ones((F_int,)),
        "gn_x_gamma": jnp.ones((F_int,)), "gn_x_beta": jnp.zeros((F_int,)),
        "gn_x_mean": jnp.zeros((F_int,)), "gn_x_var": jnp.ones((F_int,)),
        "gn_p_gamma": jnp.ones((1,)), "gn_p_beta": jnp.zeros((1,)),
        "gn_p_mean": jnp.zeros((1,)), "gn_p_var": jnp.ones((1,)),
    }
    return p


def reference_attention_gate(g_nchw, x_nchw, params, eps=1e-5):
    """Pure-JAX reference (NCHW), mirroring the PyTorch module in eval mode."""
    def conv_bn(inp, w, b, gamma, beta, mean, var):
        # 1x1 conv; w: (Cout, Cin)
        z = jnp.einsum("nchw,dc->ndhw", inp, w) + b[None, :, None, None]
        z = (z - mean[None, :, None, None]) / jnp.sqrt(var[None, :, None, None] + eps)
        return gamma[None, :, None, None] * z + beta[None, :, None, None]

    g1 = conv_bn(g_nchw, params["wg"], params["bg"], params["gn_g_gamma"],
                 params["gn_g_beta"], params["gn_g_mean"], params["gn_g_var"])
    x1 = conv_bn(x_nchw, params["wx"], params["bx"], params["gn_x_gamma"],
                 params["gn_x_beta"], params["gn_x_mean"], params["gn_x_var"])
    a = jnp.maximum(g1 + x1, 0.0)
    psi = conv_bn(a, params["wpsi"], params["bpsi"], params["gn_p_gamma"],
                  params["gn_p_beta"], params["gn_p_mean"], params["gn_p_var"])
    psi = jax.nn.sigmoid(psi)
    return x_nchw * psi


if __name__ == "__main__":
    key = jax.random.PRNGKey(0)
    k_g, k_x, k_p = jax.random.split(key, 3)

    N, F_g, F_l, F_int, H, W = 2, 4, 4, 8, 16, 16
    g = jax.random.normal(k_g, (N, F_g, H, W), jnp.float32)
    x = jax.random.normal(k_x, (N, F_l, H, W), jnp.float32)
    params = make_params(k_p, F_g, F_l, F_int)

    out = attention_gate(g, x, params)
    out = jax.block_until_ready(out)

    ref = reference_attention_gate(g, x, params)
    assert out.shape == (N, F_l, H, W)
    assert jnp.allclose(out, ref, atol=1e-5, rtol=1e-5), "mismatch vs reference"

    print("KERNEL_OK")
</pallas_src>

<mosaic_0001>
module attributes {stable_mosaic.version = 11 : i64} {
  func.func @_attention_gate_kernel(%arg0: i32, %arg1: i32, %arg2: memref<1x4x256xf32, #tpu.memory_space<vmem>>, %arg3: memref<1x4x256xf32, #tpu.memory_space<vmem>>, %arg4: memref<8x4xf32, #tpu.memory_space<vmem>>, %arg5: memref<8x4xf32, #tpu.memory_space<vmem>>, %arg6: memref<8x1xf32, #tpu.memory_space<vmem>>, %arg7: memref<8x1xf32, #tpu.memory_space<vmem>>, %arg8: memref<1x1xf32, #tpu.memory_space<vmem>>, %arg9: memref<1x4x256xf32, #tpu.memory_space<vmem>>) attributes {dimension_semantics = [#tpu.dimension_semantics<parallel>, #tpu.dimension_semantics<parallel>], iteration_bounds = array<i64: 2, 1>, scalar_prefetch = 0 : i64, scratch_operands = 0 : i64, tpu.core_type = #tpu.core_type<tc>, window_params = [{transform_indices = @transform_0, window_bounds = array<i64: 1, 4, 256>}, {transform_indices = @transform_1, window_bounds = array<i64: 1, 4, 256>}, {pipeline_mode = #tpu.pipeline_mode<synchronous>, transform_indices = @transform_2, window_bounds = array<i64: 8, 4>}, {pipeline_mode = #tpu.pipeline_mode<synchronous>, transform_indices = @transform_3, window_bounds = array<i64: 8, 4>}, {pipeline_mode = #tpu.pipeline_mode<synchronous>, transform_indices = @transform_4, window_bounds = array<i64: 8, 1>}, {pipeline_mode = #tpu.pipeline_mode<synchronous>, transform_indices = @transform_5, window_bounds = array<i64: 8, 1>}, {pipeline_mode = #tpu.pipeline_mode<synchronous>, transform_indices = @transform_6, window_bounds = array<i64: 1, 1>}, {transform_indices = @transform_7, window_bounds = array<i64: 1, 4, 256>}]} {
    %c0 = arith.constant 0 : index
    %c0_0 = arith.constant 0 : index
    %c0_1 = arith.constant 0 : index
    %0 = vector.load %arg2[%c0, %c0_0, %c0_1] : memref<1x4x256xf32, #tpu.memory_space<vmem>>, vector<1x4x256xf32>
    %1 = vector.shape_cast %0 : vector<1x4x256xf32> to vector<4x256xf32>
    %c0_2 = arith.constant 0 : index
    %c0_3 = arith.constant 0 : index
    %c0_4 = arith.constant 0 : index
    %2 = vector.load %arg3[%c0_2, %c0_3, %c0_4] : memref<1x4x256xf32, #tpu.memory_space<vmem>>, vector<1x4x256xf32>
    %3 = vector.shape_cast %2 : vector<1x4x256xf32> to vector<4x256xf32>
    %c0_5 = arith.constant 0 : index
    %c0_6 = arith.constant 0 : index
    %4 = vector.load %arg4[%c0_5, %c0_6] : memref<8x4xf32, #tpu.memory_space<vmem>>, vector<8x4xf32>
    %cst = arith.constant dense<0.000000e+00> : vector<8x256xf32>
    %5 = tpu.matmul %4, %1, %cst {dimension_numbers = #tpu.dot_dimension_numbers<[1], [0], [0], [1], [0, 0, 1, 1], [], []>} : vector<8x4xf32>, vector<4x256xf32>, vector<8x256xf32> -> vector<8x256xf32>
    %c0_7 = arith.constant 0 : index
    %c0_8 = arith.constant 0 : index
    %6 = vector.load %arg5[%c0_7, %c0_8] : memref<8x4xf32, #tpu.memory_space<vmem>>, vector<8x4xf32>
    %cst_9 = arith.constant dense<0.000000e+00> : vector<8x256xf32>
    %7 = tpu.matmul %6, %3, %cst_9 {dimension_numbers = #tpu.dot_dimension_numbers<[1], [0], [0], [1], [0, 0, 1, 1], [], []>} : vector<8x4xf32>, vector<4x256xf32>, vector<8x256xf32> -> vector<8x256xf32>
    %8 = arith.addf %5, %7 : vector<8x256xf32>
    %c0_10 = arith.constant 0 : index
    %c0_11 = arith.constant 0 : index
    %9 = vector.load %arg6[%c0_10, %c0_11] : memref<8x1xf32, #tpu.memory_space<vmem>>, vector<8x1xf32>
    %10 = vector.broadcast %9 : vector<8x1xf32> to vector<8x256xf32>
    %11 = arith.addf %8, %10 : vector<8x256xf32>
    %cst_12 = arith.constant 0.000000e+00 : f32
    %12 = vector.broadcast %cst_12 : f32 to vector<8x256xf32>
    %13 = arith.maximumf %11, %12 : vector<8x256xf32>
    %c0_13 = arith.constant 0 : index
    %c0_14 = arith.constant 0 : index
    %14 = vector.load %arg7[%c0_13, %c0_14] : memref<8x1xf32, #tpu.memory_space<vmem>>, vector<8x1xf32>
    %15 = vector.broadcast %14 : vector<8x1xf32> to vector<8x256xf32>
    %16 = arith.mulf %13, %15 : vector<8x256xf32>
    %cst_15 = arith.constant dense<0.000000e+00> : vector<256xf32>
    %17 = vector.multi_reduction <add>, %16, %cst_15 [0] : vector<8x256xf32> to vector<256xf32>
    %18 = vector.shape_cast %17 : vector<256xf32> to vector<1x256xf32>
    %c0_16 = arith.constant 0 : index
    %c0_17 = arith.constant 0 : index
    %19 = vector.load %arg8[%c0_16, %c0_17] : memref<1x1xf32, #tpu.memory_space<vmem>>, vector<1x1xf32>
    %20 = vector.broadcast %19 : vector<1x1xf32> to vector<1x256xf32>
    %21 = arith.addf %18, %20 : vector<1x256xf32>
    %22 = arith.negf %21 : vector<1x256xf32>
    %23 = math.exp %22 : vector<1x256xf32>
    %cst_18 = arith.constant 1.000000e+00 : f32
    %24 = vector.broadcast %cst_18 : f32 to vector<1x256xf32>
    %25 = arith.addf %24, %23 : vector<1x256xf32>
    %26 = arith.divf %24, %25 : vector<1x256xf32>
    %27 = vector.broadcast %26 : vector<1x256xf32> to vector<4x256xf32>
    %28 = arith.mulf %3, %27 : vector<4x256xf32>
    %c0_19 = arith.constant 0 : index
    %c0_20 = arith.constant 0 : index
    %c0_21 = arith.constant 0 : index
    %29 = vector.load %arg9[%c0_19, %c0_20, %c0_21] : memref<1x4x256xf32, #tpu.memory_space<vmem>>, vector<1x4x256xf32>
    %30 = vector.shape_cast %29 : vector<1x4x256xf32> to vector<4x256xf32>
    %31 = vector.shape_cast %28 : vector<4x256xf32> to vector<1x4x256xf32>
    tpu.vector_store %arg9[%c0_19, %c0_20, %c0_21], %31 {strides = array<i32>} : memref<1x4x256xf32, #tpu.memory_space<vmem>>, vector<1x4x256xf32>,
    return
  }
  func.func @transform_0(%arg0: i32, %arg1: i32) -> (i32, i32, i32) {
    %c0_i32 = arith.constant 0 : i32
    %c0_i32_0 = arith.constant 0 : i32
    return %arg0, %c0_i32, %arg1 : i32, i32, i32
  }
  func.func @transform_1(%arg0: i32, %arg1: i32) -> (i32, i32, i32) {
    %c0_i32 = arith.constant 0 : i32
    %c0_i32_0 = arith.constant 0 : i32
    return %arg0, %c0_i32, %arg1 : i32, i32, i32
  }
  func.func @transform_2(%arg0: i32, %arg1: i32) -> (i32, i32) {
    %c0_i32 = arith.constant 0 : i32
    %c0_i32_0 = arith.constant 0 : i32
    %c0_i32_1 = arith.constant 0 : i32
    return %c0_i32, %c0_i32_0 : i32, i32
  }
  func.func @transform_3(%arg0: i32, %arg1: i32) -> (i32, i32) {
    %c0_i32 = arith.constant 0 : i32
    %c0_i32_0 = arith.constant 0 : i32
    %c0_i32_1 = arith.constant 0 : i32
    return %c0_i32, %c0_i32_0 : i32, i32
  }
  func.func @transform_4(%arg0: i32, %arg1: i32) -> (i32, i32) {
    %c0_i32 = arith.constant 0 : i32
    %c0_i32_0 = arith.constant 0 : i32
    %c0_i32_1 = arith.constant 0 : i32
    return %c0_i32, %c0_i32_0 : i32, i32
  }
  func.func @transform_5(%arg0: i32, %arg1: i32) -> (i32, i32) {
    %c0_i32 = arith.constant 0 : i32
    %c0_i32_0 = arith.constant 0 : i32
    %c0_i32_1 = arith.constant 0 : i32
    return %c0_i32, %c0_i32_0 : i32, i32
  }
  func.func @transform_6(%arg0: i32, %arg1: i32) -> (i32, i32) {
    %c0_i32 = arith.constant 0 : i32
    %c0_i32_0 = arith.constant 0 : i32
    %c0_i32_1 = arith.constant 0 : i32
    return %c0_i32, %c0_i32_0 : i32, i32
  }
  func.func @transform_7(%arg0: i32, %arg1: i32) -> (i32, i32, i32) {
    %c0_i32 = arith.constant 0 : i32
    %c0_i32_0 = arith.constant 0 : i32
    return %arg0, %c0_i32, %arg1 : i32, i32, i32
  }
}

</mosaic_0001>

<bundles_post_ra>
// kernel: tpu_custom_call.1
= control target key start
LH: loop header
LB: loop body
LE: loop exit
PB: predicated region body
PF: predicated region fallthrough
CT: control target
= control target key end

     0   :  { %s1624_s0 = inlined_call_operand.hbm [shape: f32[2,4,256], index: 0, kind: input, shape index: {}]   ;;  %s1625_s1 = inlined_call_operand.hbm [shape: f32[2,4,256], index: 1, kind: input, shape index: {}]   ;;  %s1626_s2 = inlined_call_operand.hbm [shape: f32[8,4], index: 2, kind: input, shape index: {}]   ;;  %s1627_s3 = inlined_call_operand.hbm [shape: f32[8,4], index: 3, kind: input, shape index: {}]   ;;  %s1628_s4 = inlined_call_operand.hbm [shape: f32[8,1], index: 4, kind: input, shape index: {}]   ;;  %s1629_s5 = inlined_call_operand.hbm [shape: f32[8,1], index: 5, kind: input, shape index: {}]   ;;  %s1630_s6 = inlined_call_operand.<no memory space> [shape: f32[1,1], index: 6, kind: input, shape index: {}]   ;;  %s1631_s7 = inlined_call_operand.hbm [shape: f32[2,4,256], index: 7, kind: output, shape index: {}]  }
   0x1   :  { %1637 = sst [smem:[#allocation22_spill]] %s1626_s2  ;;  %v12_v0 = vstv %s1630_s6 }
   0x2   :  { %1638 = sst [smem:[#allocation23_spill]] %s1627_s3  ;;  %13 = vst [vmem:[#allocation2] sm:$0x1] %v12_v0 }
   0x3   :  { %1639 = sst [smem:[#allocation24_spill]] %s1628_s4 }
   0x4   :  { %1640 = sst [smem:[#allocation25_spill]] %s1629_s5 }
   0x5   :  { %14 = vsyncpa [#allocation4], 0 }
   0x6   :  { %16 = vsyncpa [#allocation4 + $0x1], 0 }
   0x7   :  { %17 = vsyncpa [#allocation7], 0 }
   0x8   :  { %19 = vsyncpa [#allocation7 + $0x1], 0 }
   0x9   :  { %20 = vsyncpa [#allocation10], 0 }
   0xa   :  { %21 = vsyncpa [#allocation13], 0 }
   0xb   :  { %22 = vsyncpa [#allocation5], 0 }
   0xc   :  { %24 = vsyncpa [#allocation5 + $0x1], 0  ;;  %s1287_s26 = smov 0   ;;  %s1289_s27 = smov 0  }
   0xd   :  { %s1291_s28 = smov 0   ;;  %s1293_s29 = smov 0  }
   0xe   :  { %s1295_s30 = smov 0   ;;  %s1297_s6 = smov 0  }
   0xf LB: > { %s1318_s8 = sadd.s32 4294967295, %s1233_s6   ;;  %p803_p0 = scmp.ge.s32.totalorder %s1233_s6, 1  ;;  %s1233_s6 = sphi %s1297_s6, %s30_s6   ;;  %s1229_s30 = sphi %s1295_s30, %s1671_s30   ;;  %s1225_s29 = sphi %s1293_s29, %s1670_s29   ;;  %s1221_s28 = sphi %s1291_s28, %s1669_s28   ;;  %s1217_s27 = sphi %s1289_s27, %s1668_s27   ;;  %s1213_s26 = sphi %s1287_s26, %s1667_s26  }
  0x10   : > { %p1632_p1 = scmp.eq.s32.totalorder %s1318_s8, 0  ;;  %p236_p2 = scmp.lt.s32.totalorder %s1233_s6, 3 }
  0x11   : > { %s1235_s10 = smov [#allocation8]   ;;  %s1236_s12 = smov [#allocation9]  }
  0x12   : > { %p1323_p3 = pnand %p803_p0, %p236_p2  ;;  %s249_s11 = sshll.u32 %s1235_s10, 4  ;;  %s250_s11 = int_to_ptr.vmem [resolvable:$true] %s249_s11 }
  0x13   : > { %s260_s13 = sshll.u32 %s1236_s12, 4  ;;  %s1237_s15 = smov [#allocation11]   ;;  %s1336_s13 = int_to_ptr.vmem [resolvable:$true] %s260_s13 }
  0x14   : > { %s1641_s9 = scalar_select %p1323_p3, 1, 0 }
  0x15   : > { %p863_p5 = pneg %p1323_p3  ;;  %s271_s16 = sshll.u32 %s1237_s15, 4  ;;  %s1338_s16 = int_to_ptr.vmem [resolvable:$true] %s271_s16 }
  0x16   : > { %s1643_s2 = sld [smem:[#allocation22_spill]] }
  0x17   : > { %p1332_p6 = pnand %p863_p5, %p1632_p1 }
  0x19   : > { %p1348_p8 = pneg %p1332_p6 }
  0x1c   : > { %s963_s19 = scalar_lea.hbm %s1643_s2, 128 }
  0x1d   : > { %p964_p7 = scmp.ne.s32.totalorder %s1643_s2, %s963_s19  ;;  %p970_p11 = scmp.lt.u32.totalorder %s963_s19, %s1643_s2 }
  0x1f   : > { %p966_p9 = pnand %p1348_p8, %p964_p7 }
  0x21   : > { %p967_p10 = pneg %p966_p9 }
  0x23   : > { %p972_p12 = pnand %p970_p11, %p967_p10 }
  0x25   : > { %975 = shalt.err (!%p972_p12)
}
  0x26   : > { %s976_s25 = scalar_lea.vmem %s250_s11, 128  ;;  %p984_p5 = scmp.lt.s32.totalorder %s250_s11, %s250_s11 }
  0x27   : > { %p977_p13 = scmp.ne.s32.totalorder %s250_s11, %s976_s25  ;;  %p985_p4 = scmp.lt.s32.totalorder %s976_s25, %s976_s25 }
  0x29   : > { %p979_p0 = pnand %p977_p13, %p1348_p8  ;;  %p986_p1 = por %p985_p4, %p984_p5 }
  0x2b   : > { %p980_p2 = pneg %p979_p0 }
  0x2d   : > { %p987_p3 = pnand %p986_p1, %p980_p2 }
  0x2f   : > { %990 = shalt.err (!%p987_p3)
}
  0x30   : > { %866 = dma.hbm_to_vmem [thread:$0]  (!%p1332_p6), %s1643_s2, 128, %s250_s11, [#allocation7]  }
  0x31   : > { %s1645_s3 = sld [smem:[#allocation23_spill]] }
  0x37   : > { %s991_s18 = scalar_lea.hbm %s1645_s3, 128 }
  0x38   : > { %p992_p7 = scmp.ne.s32.totalorder %s1645_s3, %s991_s18  ;;  %p998_p1 = scmp.lt.u32.totalorder %s991_s18, %s1645_s3 }
  0x3a   : > { %p994_p9 = pnand %p992_p7, %p1348_p8 }
  0x3c   : > { %p995_p4 = pneg %p994_p9 }
  0x3e   : > { %p1000_p3 = pnand %p998_p1, %p995_p4 }
  0x40   : > { %1003 = shalt.err (!%p1000_p3)
}
  0x41   : > { %s1004_s11 = scalar_lea.vmem %s1336_s13, 128  ;;  %p1012_p13 = scmp.lt.s32.totalorder %s1336_s13, %s1336_s13 }
  0x42   : > { %p1005_p10 = scmp.ne.s32.totalorder %s1336_s13, %s1004_s11  ;;  %p1013_p0 = scmp.lt.s32.totalorder %s1004_s11, %s1004_s11 }
  0x44   : > { %p1007_p11 = pnand %p1005_p10, %p1348_p8  ;;  %p1014_p2 = por %p1013_p0, %p1012_p13 }
  0x46   : > { %p1008_p12 = pneg %p1007_p11 }
  0x48   : > { %p1015_p5 = pnand %p1014_p2, %p1008_p12 }
  0x4a   : > { %1018 = shalt.err (!%p1015_p5)
}
  0x4b   : > { %869 = dma.hbm_to_vmem [thread:$0]  (!%p1332_p6), %s1645_s3, 128, %s1336_s13, [#allocation10]  }
  0x4c   : > { %s1646_s4 = sld [smem:[#allocation24_spill]] }
  0x52   : > { %s1019_s15 = scalar_lea.hbm %s1646_s4, 128 }
  0x53   : > { %p1020_p7 = scmp.ne.s32.totalorder %s1646_s4, %s1019_s15  ;;  %p1026_p1 = scmp.lt.u32.totalorder %s1019_s15, %s1646_s4 }
  0x55   : > { %p1022_p9 = pnand %p1020_p7, %p1348_p8 }
  0x57   : > { %p1023_p4 = pneg %p1022_p9 }
  0x59   : > { %p1028_p3 = pnand %p1026_p1, %p1023_p4 }
  0x5b   : > { %1031 = shalt.err (!%p1028_p3)
}
  0x5c   : > { %s1032_s13 = scalar_lea.vmem %s1338_s16, 128  ;;  %p1040_p13 = scmp.lt.s32.totalorder %s1338_s16, %s1338_s16 }
  0x5d   : > { %p1033_p10 = scmp.ne.s32.totalorder %s1338_s16, %s1032_s13  ;;  %p1041_p0 = scmp.lt.s32.totalorder %s1032_s13, %s1032_s13 }
  0x5f   : > { %p1035_p11 = pnand %p1033_p10, %p1348_p8  ;;  %p1042_p2 = por %p1041_p0, %p1040_p13 }
  0x61   : > { %p1036_p12 = pneg %p1035_p11 }
  0x63   : > { %p1043_p5 = pnand %p1042_p2, %p1036_p12 }
  0x65   : > { %1046 = shalt.err (!%p1043_p5)
}
  0x66   : > { %872 = dma.hbm_to_vmem [thread:$0]  (!%p1332_p6), %s1646_s4, 128, %s1338_s16, [#allocation10]  }
  0x67   : > { %s1238_s11 = smov [#allocation12]   ;;  %s1647_s5 = sld [smem:[#allocation25_spill]] }
  0x68   : > { %s282_s24 = sshll.u32 %s1238_s11, 4  ;;  %s283_s24 = int_to_ptr.vmem [resolvable:$true] %s282_s24 }
  0x6d   : > { %s1047_s12 = scalar_lea.hbm %s1647_s5, 128 }
  0x6e   : > { %p1048_p7 = scmp.ne.s32.totalorder %s1647_s5, %s1047_s12  ;;  %p1054_p1 = scmp.lt.u32.totalorder %s1047_s12, %s1647_s5 }
  0x70   : > { %p1050_p9 = pnand %p1048_p7, %p1348_p8 }
  0x72   : > { %p1051_p4 = pneg %p1050_p9 }
  0x74   : > { %p1056_p3 = pnand %p1054_p1, %p1051_p4 }
  0x76   : > { %1059 = shalt.err (!%p1056_p3)
}
  0x77   : > { %s1060_s16 = scalar_lea.vmem %s283_s24, 128  ;;  %p1068_p13 = scmp.lt.s32.totalorder %s283_s24, %s283_s24 }
  0x78   : > { %p1061_p10 = scmp.ne.s32.totalorder %s283_s24, %s1060_s16  ;;  %p1069_p0 = scmp.lt.s32.totalorder %s1060_s16, %s1060_s16 }
  0x7a   : > { %p1063_p11 = pnand %p1061_p10, %p1348_p8  ;;  %p1070_p2 = por %p1069_p0, %p1068_p13 }
  0x7c   : > { %p1064_p12 = pneg %p1063_p11 }
  0x7e   : > { %p1071_p5 = pnand %p1070_p2, %p1064_p12 }
  0x80   : > { %1074 = shalt.err (!%p1071_p5)
}
  0x81   : > { %875 = dma.hbm_to_vmem [thread:$0]  (!%p1332_p6), %s1647_s5, 128, %s283_s24, [#allocation13]  }
  0x82   : > { %s802_s22 = sadd.s32 4294967294, %s1233_s6   ;;  %s42_s21 = sadd.s32 1, %s1229_s30 }
  0x83   : > { %p44_p8 = scmp.ge.s32.totalorder %s42_s21, 2  ;;  %s51_s14 = sadd.s32 1, %s1221_s28 }
  0x84   : > { %p58_p7 = scmp.ne.s32.totalorder %s1221_s28, %s1217_s27  ;;  %p59_p9 = scmp.eq.s32.totalorder %s1233_s6, 0 }
  0x85   : > { %s1673_s21 = smov (%p44_p8, %s42_s21), 0  ;;  %p64_p1 = scmp.ne.s32.totalorder %s1217_s27, %s1213_s26 }
  0x86   : > { %1648 = sst [smem:[#allocation21_spill]] %s1673_s21  ;;  %p1436_p4 = por %p59_p9, %p58_p7 }
  0x87   : > { %s46_s11 = ssub.s32 %s1229_s30, %s1673_s21  ;;  %p223_p6 = scmp.eq.s32.totalorder %s1318_s8, 1 }
  0x88   : > { %p49_p3 = scmp.eq.s32.totalorder %s46_s11, 0  ;;  %p1650_p10 = scmp.eq.s32.totalorder %s1318_s8, 0 }
  0x89   : > { %p1451_p12 = por %p223_p6, %p58_p7  ;;  %p229_p13 = scmp.eq.s32.totalorder %s802_s22, 1 }
  0x8a   : > { %p1447_p11 = por %p1650_p10, %p64_p1  ;;  %p891_p2 = scmp.lt.s32.totalorder %s1233_s6, 2 }
  0x8b   : > { %s1652_s25 = scalar_select %p1451_p12, 1, 0 }
  0x8c   : > { %s1651_s24 = scalar_select %p1447_p11, 1, 0 }
  0x8d   : > { %s1456_s10 = scalar_select %p49_p3, %s1221_s28, %s51_s14  }
  0x8e   : > { %p1458_p0 = por %p229_p13, %p64_p1  ;;  %s296_s15 = sand.u32 1, %s1221_s28  }
  0x8f   : > { %s836_s17 = sshll.u32 %s1229_s30, 7  ;;  %s1465_s18 = sshll.u32 %s296_s15, 3 }
  0x90   : > { %s1653_s12 = scalar_select %p1458_p0, 1, 0 }
  0x91   : > { %s1470_s20 = scalar_lea.hbm %s1624_s0, %s836_s17  ;;  %s300_s13 = scalar_lea.vmem [#allocation3], %s1465_s18 }
  0x92   : > { %s310_s22 = sshll.u32 %s300_s13, 4  ;;  %p1475_p5 = pnand %p891_p2, %p1436_p4  ;;  %s1479_s22 = int_to_ptr.vmem [resolvable:$true] %s310_s22 }
  0x93   : > { %s1484_s16 = scalar_lea.hbm %s1625_s1, %s836_s17  ;;  %s297_s2 = scalar_lea.sflag [#allocation4], %s296_s15 }
  0x94   : > { %s1075_s3 = scalar_lea.hbm %s1470_s20, 128  ;;  %p1077_p7 = pneg %p1475_p5 }
  0x95   : > { %p1076_p8 = scmp.ne.s32.totalorder %s1470_s20, %s1075_s3  ;;  %s1080_s4 = scalar_lea.hbm %s1624_s0, 256 }
  0x96   : > { %p1081_p1 = scmp.lt.u32.totalorder %s1470_s20, %s1624_s0  ;;  %p1082_p6 = scmp.lt.u32.totalorder %s1080_s4, %s1075_s3 }
  0x97   : > { %p1078_p9 = pnand %p1077_p7, %p1076_p8  ;;  %p1084_p10 = scmp.lt.u32.totalorder %s1075_s3, %s1470_s20 }
  0x98   : > { %p1083_p3 = por %p1082_p6, %p1081_p1 }
  0x99   : > { %p1079_p4 = pneg %p1078_p9 }
  0x9a   : > { %p1085_p13 = por %p1084_p10, %p1083_p3 }
  0x9c   : > { %p1086_p2 = pnand %p1085_p13, %p1079_p4 }
  0x9e   : > { %1089 = shalt.err (!%p1086_p2)
}
  0x9f   : > { %s1090_s15 = scalar_lea.vmem %s1479_s22, 128  ;;  %s1239_s17 = smov [#allocation3]  }
  0xa0   : > { %p1091_p8 = scmp.ne.s32.totalorder %s1479_s22, %s1090_s15  ;;  %s1095_s11 = sshll.u32 %s1239_s17, 4  ;;  %s1096_s11 = int_to_ptr.vmem [resolvable:$false] %s1095_s11 }
  0xa1   : > { %s1097_s5 = scalar_lea.vmem %s1096_s11, 256  ;;  %p1098_p12 = scmp.lt.s32.totalorder %s1479_s22, %s1096_s11 }
  0xa2   : > { %p1093_p9 = pnand %p1091_p8, %p1077_p7  ;;  %p1099_p1 = scmp.lt.s32.totalorder %s1097_s5, %s1090_s15 }
  0xa4   : > { %p1094_p0 = pneg %p1093_p9  ;;  %p1100_p6 = por %p1099_p1, %p1098_p12 }
  0xa6   : > { %p1101_p3 = pnand %p1100_p6, %p1094_p0 }
  0xa8   : > { %1104 = shalt.err (!%p1101_p3)
}
  0xa9   : > { %879 = dma.hbm_to_vmem [thread:$0]  (!%p1475_p5), %s1470_s20, 128, %s1479_s22, %s297_s2  }
  0xaa   : > { %s317_s3 = sand.u32 1, %s1233_s6   ;;  %s321_s4 = scalar_lea.vmem [#allocation6], %s1465_s18 }
  0xab   : > { %s331_s21 = sshll.u32 %s321_s4, 4  ;;  %s318_s19 = scalar_lea.sflag [#allocation7], %s317_s3  ;;  %s332_s21 = int_to_ptr.vmem [resolvable:$true] %s331_s21 }
  0xac   : > { %s1105_s23 = scalar_lea.hbm %s1484_s16, 128  ;;  %s1110_s17 = scalar_lea.hbm %s1625_s1, 256 }
  0xad   : > { %p1106_p12 = scmp.ne.s32.totalorder %s1484_s16, %s1105_s23  ;;  %p1111_p10 = scmp.lt.u32.totalorder %s1484_s16, %s1625_s1 }
  0xae   : > { %p1112_p13 = scmp.lt.u32.totalorder %s1110_s17, %s1105_s23  ;;  %p1114_p8 = scmp.lt.u32.totalorder %s1105_s23, %s1484_s16 }
  0xaf   : > { %p1108_p0 = pnand %p1106_p12, %p1077_p7 }
  0xb0   : > { %p1113_p2 = por %p1112_p13, %p1111_p10 }
  0xb1   : > { %p1109_p4 = pneg %p1108_p0 }
  0xb2   : > { %p1115_p9 = por %p1114_p8, %p1113_p2 }
  0xb4   : > { %p1116_p1 = pnand %p1115_p9, %p1109_p4 }
  0xb6   : > { %1119 = shalt.err (!%p1116_p1)
}
  0xb7   : > { %s1120_s2 = scalar_lea.vmem %s332_s21, 128  ;;  %s1240_s18 = smov [#allocation6]  }
  0xb8   : > { %p1121_p6 = scmp.ne.s32.totalorder %s332_s21, %s1120_s2  ;;  %s1125_s20 = sshll.u32 %s1240_s18, 4  ;;  %s1126_s20 = int_to_ptr.vmem [resolvable:$false] %s1125_s20 }
  0xb9   : > { %s1127_s22 = scalar_lea.vmem %s1126_s20, 256  ;;  %p1128_p0 = scmp.lt.s32.totalorder %s332_s21, %s1126_s20 }
  0xba   : > { %p1123_p3 = pnand %p1121_p6, %p1077_p7  ;;  %p1129_p11 = scmp.lt.s32.totalorder %s1127_s22, %s1120_s2 }
  0xbc   : > { %p1124_p12 = pneg %p1123_p3  ;;  %p1130_p10 = por %p1129_p11, %p1128_p0 }
  0xbe   : > { %p1131_p13 = pnand %p1130_p10, %p1124_p12 }
  0xc0   : > { %1134 = shalt.err (!%p1131_p13)
}
  0xc1   : > { %882 = dma.hbm_to_vmem [thread:$0]  (!%p1475_p5), %s1484_s16, 128, %s332_s21, %s318_s19  }
  0xc2   : > { %p1655_p4 = scmp.ne.s32.totalorder %s1641_s9, 0 }
  0xc3   : > { %s1535_s3 = sand.u32 (!%p1655_p4), 1, %s1217_s27   ;;  %p1656_p11 = scmp.ne.s32.totalorder (!%p1655_p4), %s1651_s24, 0 }
  0xc4   : > { %340 = sbr.rel (%p1655_p4) target bundleno = 501 (0x1f5), region = 48  ;;  %s1538_s4 = sshll.u32 (!%p1655_p4), %s1535_s3, 3 }
  0xc5   : > { %s343_s23 = scalar_lea.sflag (!%p1655_p4), [#allocation4], %s1535_s3  ;;  %s346_s13 = scalar_lea.vmem (!%p1655_p4), [#allocation3], %s1538_s4 }
  0xcb   : > { %1188 = dma.done.wait (%p1656_p11), %s343_s23, 128  }
  0xcc   : > { %1190 = vsyncadd (%p1656_p11), %s343_s23, 4294967168  ;;  %s351_s9 = sand.u32 1, %s1318_s8   ;;  %s355_s16 = scalar_lea.vmem [#allocation6], %s1538_s4 }
  0xcd   : > { %s352_s14 = scalar_lea.sflag [#allocation7], %s351_s9 }
  0xce   : > { %1192 = dma.done.wait (%p1656_p11), %s352_s14, 128  }
  0xcf   : > { %1194 = vsyncadd (%p1656_p11), %s352_s14, 4294967168  ;;  %p1657_p5 = scmp.eq.s32.totalorder %s1318_s8, 0 }
  0xd1   : > { %1196 = dma.done.wait (%p1657_p5), [#allocation7], 128   ;;  %p1658_p7 = pmov %p1657_p5 }
  0xd2   : > { %p1659_p2 = pmov %p1657_p5 }
  0xd3   : > { %1198 = vsyncadd (%p1658_p7), [#allocation7], 4294967168 }
  0xd4   : > { %1200 = dma.done.wait (%p1659_p2), [#allocation10], 256   ;;  %p1660_p8 = pmov %p1659_p2 }
  0xd5   : > { %p1661_p9 = pmov %p1659_p2 }
  0xd6   : > { %1202 = vsyncadd (%p1660_p8), [#allocation10], 4294967040 }
  0xd7   : > { %1204 = dma.done.wait (%p1661_p9), [#allocation13], 128   ;;  %p1662_p1 = pmov %p1659_p2 }
  0xd8   : > { %v1241_v1 = vmov 0.0   ;;  %v1242_v2 = vmov 0   ;;  %v1564_v3 = vld [vmem:[%s355_s16] sm:$0xff]  ;;  %vm420_vm0 = vcmask 1043456   ;;  %v410_v4 = vld [vmem:[%s346_s13] sm:$0xff]  ;;  %vm416_vm1 = vcmask 31744  }
  0xd9   : > { %1206 = vsyncadd (%p1662_p1), [#allocation13], 4294967168  ;;  %489 = vmatprep.mubr.f32.mxu1 %v1241_v1  ;;  %569 = vmatprep.mubr.f32.mxu0 %v1241_v1  ;;  %v415_v5 = vcombine.high %v1564_v3, %v1564_v3  ;;  %v497_v6 = vcombine.high %v410_v4, %v410_v4  ;;  %v576_v7 = vld [vmem:[#allocation11] sm:$0xff]  ;;  %v413_v8 = vld [vmem:[#allocation9] sm:$0xff]  ;;  %v612_v22 = vlaneseq  ;;  %s838_s8 = sshll.u32 %s1225_s29, 7  ;;  %s406_s24 = scalar_lea.vmem [#allocation14], %s1538_s4 }
  0xda   : > { %951 = vset.pattern.permute.xlu0 %v1242_v2  ;;  %952 = vset.pattern.permute.xlu1 %v1242_v2  ;;  %v412_v9 = vld [vmem:[#allocation8] sm:$0xff]  ;;  %v586_v10 = vld [vmem:[#allocation12] sm:$0xff]  ;;  %s653_s21 = sshll.u32 %s406_s24, 4  ;;  %s1575_s17 = scalar_lea.hbm %s1631_s7, %s838_s8  ;;  %s1577_s21 = int_to_ptr.vmem [resolvable:$true] %s653_s21 }
  0xdb   : > { %579 = vperm.xlu0 %951, %v576_v7   ;;  %823 = vmatprep.subr.msk.mxu1 %vm420_vm0, %v415_v5  ;;  %v606_v11 = vld [vmem:[#allocation2] sm:$0x1]  ;;  %v613_v28 = vshrl.u32 %v612_v22, 7  ;;  %s637_s11 = scalar_lea.sflag [#allocation5], %s1535_s3  ;;  %s1135_s5 = scalar_lea.vmem %s1577_s21, 128 }
  0xdc   : > { %826 = vmatprep.subr.msk.mxu0 %vm420_vm0, %v497_v6  ;;  %824 = vmatpush1.msk.msra.mxu1 %vm420_vm0, %v1564_v3  ;;  %p1136_p6 = scmp.ne.s32.totalorder %s1577_s21, %s1135_s5  ;;  %p1663_p3 = scmp.ne.s32.totalorder %s1652_s25, 0 }
  0xdd   : > { %827 = vmatpush1.msk.msra.mxu0 %vm420_vm0, %v410_v4  ;;  %825 = vmatmul.mubr.msk.f32.vlgmr.msra.gmra.mrb[0].mxu1 %vm416_vm1, %v413_v8  ;;  %v614_v33 = vsub.s32 0, %v613_v28  ;;  %s1243_s29 = smov [#allocation14]  }
  0xde   : > { %828 = vmatmul.mubr.msk.f32.vlgmr.msra.gmra.mrb[0].mxu0 %vm416_vm1, %v412_v9  ;;  %609 = vperm.xlu1 %952, %v606_v11   ;;  %p1137_p12 = pnand %p1136_p6, %p1663_p3  ;;  %s1139_s2 = sshll.u32 %s1243_s29, 4  ;;  %s1140_s2 = int_to_ptr.vmem [resolvable:$false] %s1139_s2 }
  0xdf   : > { %589 = vperm.xlu0 %951, %v586_v10   ;;  %s1141_s18 = scalar_lea.vmem %s1140_s2, 256  ;;  %p1142_p10 = scmp.lt.s32.totalorder %s1577_s21, %s1140_s2 }
  0xe0   : > { %p1138_p0 = pneg %p1137_p12  ;;  %p1143_p13 = scmp.lt.s32.totalorder %s1141_s18, %s1135_s5 }
  0xe2   : > { %p1144_p4 = por %p1143_p13, %p1142_p10 }
  0xe4   : > { %p1145_p11 = pnand %p1144_p4, %p1138_p0 }
 0x15a   : > { %v580_v12 = vpop.permute.xlu0 %579 }
 0x15d   : > { %v610_v35 = vpop.permute.xlu1 %609 }
 0x15e   : > { %v590_v23 = vpop.permute.xlu0 %589  ;;  %v615_v39 = vrot.slane %v610_v35, %v614_v33 }
 0x1b0   : > { %v491_v13 = vpop.f32.mrb[0].mxu1 }
 0x1b1   : > { %v571_v14 = vpop.f32.mrb[0].mxu0  ;;  %v493_v16 = vpop.f32.mrb[1].mxu1 }
 0x1b2   : > { %v572_v15 = vadd.f32 %v571_v14, %v491_v13  ;;  %v573_v17 = vpop.f32.mrb[1].mxu0 }
 0x1b3   : > { %v574_v18 = vadd.f32 %v573_v17, %v493_v16 }
 0x1b4   : > { %v582_v19 = vadd.f32 %v580_v12, %v572_v15 }
 0x1b5   : > { %v583_v20 = vadd.f32 %v580_v12, %v574_v18 }
 0x1b6   : > { %v584_v21 = vmax.f32 %v582_v19, 0.0 }
 0x1b7   : > { %v585_v24 = vmax.f32 %v583_v20, 0.0 }
 0x1b8   : > { %v592_v25 = vmul.f32 %v590_v23, %v584_v21 }
 0x1b9   : > { %v593_v26 = vmul.f32 %v590_v23, %v585_v24 }
 0x1ba   : > { %v594_v27 = vrot.slane %v592_v25, 4 }
 0x1bb   : > { %v600_v29 = vrot.slane %v593_v26, 4 }
 0x1bc   : > { %v595_v30 = vadd.f32 %v594_v27, %v592_v25 }
 0x1bd   : > { %v601_v31 = vadd.f32 %v600_v29, %v593_v26 }
 0x1be   : > { %v596_v32 = vrot.slane %v595_v30, 2 }
 0x1bf   : > { %v602_v34 = vrot.slane %v601_v31, 2 }
 0x1c0   : > { %v597_v36 = vadd.f32 %v596_v32, %v595_v30 }
 0x1c1   : > { %v603_v37 = vadd.f32 %v602_v34, %v601_v31 }
 0x1c2   : > { %v598_v38 = vrot.slane %v597_v36, 1 }
 0x1c3   : > { %v604_v40 = vrot.slane %v603_v37, 1 }
 0x1c4   : > { %v599_v41 = vadd.f32 %v598_v38, %v597_v36 }
 0x1c5   : > { %v605_v42 = vadd.f32 %v604_v40, %v603_v37 }
 0x1c6   : > { %v616_v43 = vadd.f32 %v615_v39, %v599_v41 }
 0x1c7   : > { %v617_v44 = vadd.f32 %v615_v39, %v605_v42 }
 0x1c8   : > { %v829_v45 = vmul.f32 -1.442695, %v616_v43 }
 0x1c9   : > { %v830_v46 = vmul.f32 -1.442695, %v617_v44 }
 0x1ca   : > { %955 = vpow2.f32 %v829_v45 }
 0x1cb   : > { %957 = vpow2.f32 %v830_v46 }
 0x1d4   : > { %v956_v47 = vpop.eup %955 }
 0x1d5   : > { %v958_v48 = vpop.eup %957  ;;  %v624_v49 = vadd.f32 1.0, %v956_v47 }
 0x1d6   : > { %v625_v50 = vadd.f32 1.0, %v958_v48 }
 0x1d7   : > { %959 = vrcp.f32 %v624_v49 }
 0x1d8   : > { %961 = vrcp.f32 %v625_v50 }
 0x1e1   : > { %v960_v51 = vpop.eup %959 }
 0x1e2   : > { %v962_v52 = vpop.eup %961 }
 0x1e3   : > { %v632_v53 = vcombine.low %v960_v51, %v962_v52 }
 0x1e5   : > { %v634_v54 = vmul.f32 %v632_v53, %v1564_v3 }
 0x1e7   : > { %635 = vst [vmem:[%s406_s24] sm:$0xff] %v634_v54 }
 0x1e8   : > { %1148 = shalt.err (!%p1145_p11)
}
 0x1e9   : > { %s1149_s20 = scalar_lea.hbm %s1575_s17, 128  ;;  %s1153_s4 = scalar_lea.hbm %s1631_s7, 256 }
 0x1ea   : > { %p1150_p5 = scmp.ne.s32.totalorder %s1575_s17, %s1149_s20  ;;  %p1154_p8 = scmp.lt.u32.totalorder %s1575_s17, %s1631_s7 }
 0x1eb   : > { %p1155_p9 = scmp.lt.u32.totalorder %s1153_s4, %s1149_s20  ;;  %p1157_p6 = scmp.lt.u32.totalorder %s1149_s20, %s1575_s17 }
 0x1ec   : > { %p1151_p7 = pnand %p1150_p5, %p1663_p3 }
 0x1ed   : > { %p1156_p1 = por %p1155_p9, %p1154_p8 }
 0x1ee   : > { %p1152_p2 = pneg %p1151_p7 }
 0x1ef   : > { %p1158_p12 = por %p1157_p6, %p1156_p1 }
 0x1f1   : > { %p1159_p0 = pnand %p1158_p12, %p1152_p2 }
 0x1f3   : > { %1162 = shalt.err (!%p1159_p0)
}
 0x1f4   : > { %861 = dma.vmem_to_hbm [thread:$0]  (%p1663_p3), %s1577_s21, 128, %s1575_s17, %s637_s11  }
 0x1f5 PF: > { %s665_s9 = sand.u32 1, %s1213_s26   ;;  %p1664_p10 = scmp.ne.s32.totalorder %s1653_s12, 0 }
 0x1f6   : > { %p1665_p13 = scmp.ge.s32.totalorder %s1233_s6, 2  ;;  %s666_s14 = scalar_lea.sflag [#allocation5], %s665_s9 }
 0x1f8   : > { %p884_p4 = pnand %p1665_p13, %p1664_p10 }
 0x1fa   : > { %1208 = dma.done.wait (!%p884_p4), %s666_s14, 128  }
 0x1fb   : > { %1210 = vsyncadd (!%p884_p4), %s666_s14, 4294967168  ;;  %s30_s6 = sadd.s32 1, %s1233_s6   ;;  %s1666_s25 = sld [smem:[#allocation21_spill]] }
 0x1fc   : > { %p27_p11 = scmp.ge.s32.totalorder %s30_s6, 4   ;;  %s1667_s26 = smov %s1217_s27 }
 0x1fd   : > { %s1668_s27 = smov %s1221_s28  ;;  %s1669_s28 = smov %s1456_s10 }
 0x1fe   : > { %s1670_s29 = smov %s1229_s30  ;;  %29 = sbr.rel (!%p27_p11) target bundleno = 15 (0xf), region = 122 }
 0x201   : > { %s1671_s30 = smov %s1666_s25 }
 0x205   :  { %671 = vsyncpa [#allocation4], 1 }
 0x206   :  { %673 = vsyncpa [#allocation4 + $0x1], 1 }
 0x207   :  { %674 = vsyncpa [#allocation7], 1 }
 0x208   :  { %676 = vsyncpa [#allocation7 + $0x1], 1 }
 0x209   :  { %677 = vsyncpa [#allocation10], 1 }
 0x20a   :  { %678 = vsyncpa [#allocation13], 1 }
 0x20b   :  { %679 = vsyncpa [#allocation5], 1 }
 0x20c   :  { %681 = vsyncpa [#allocation5 + $0x1], 1 }

</bundles_post_ra>
